<compile_context>
chip_gen: v5e
topology: v5e:2x2
jax: 0.10.0
libtpu: 0.0.40
codegen_flags: <defaults>
</compile_context>

<pallas_src>
import functools
import math

import jax
import jax.numpy as jnp
from jax.experimental import pallas as pl
from jax.experimental.pallas import tpu as pltpu


M_MARGIN = 0.25
GAMMA = 128.0
NEG = -1.0e30          # "minus infinity" sentinel for masked logits


def _round_up(x, m):
    return ((x + m - 1) // m) * m


def _moco_tile_kernel(qmean_ref, plabel_ref, lpself_ref, lnself_ref,
                      mem_ref, mlab_ref,
                      mp_ref, lp_ref, mn_ref, ln_ref,
                      *, K, TK, tiles_per_core, n_tiles, mask_cols, skip_oob):
    c = pl.program_id(0)          # queue-half index ("parallel", split over TCs)
    j = pl.program_id(1)          # K-tile index within this half ("arbitrary")
    k_tile = c * tiles_per_core + j

    # ---- init running logsumexp state; fold the self column exactly once ----
    @pl.when(jnp.logical_and(j == 0, c == 0))
    def _init_core0():
        mp_ref[...] = lpself_ref[...]
        lp_ref[...] = jnp.ones(lp_ref.shape, jnp.float32)
        mn_ref[...] = lnself_ref[...]
        ln_ref[...] = jnp.ones(ln_ref.shape, jnp.float32)

    @pl.when(jnp.logical_and(j == 0, c != 0))
    def _init_other():
        mp_ref[...] = jnp.full(mp_ref.shape, NEG, jnp.float32)
        lp_ref[...] = jnp.zeros(lp_ref.shape, jnp.float32)
        mn_ref[...] = jnp.full(mn_ref.shape, NEG, jnp.float32)
        ln_ref[...] = jnp.zeros(ln_ref.shape, jnp.float32)

    def compute():
        # ---- similarity for this queue tile:  (B, TK) = qmean @ mem_tile^T ----
        mem = mem_ref[...]                                 # (TK, D), stored dtype
        qm = qmean_ref[...].astype(mem.dtype)              # tiny (B, D)
        s = jax.lax.dot_general(qm, mem, (((1,), (1,)), ((), ())),
                                preferred_element_type=jnp.float32)   # (B, TK)

        # ---- pos/neg selection (where-select, no mask multiplies) ----
        is_pos = plabel_ref[...] == mlab_ref[...]          # (B, TK) bool
        logit_p = (-GAMMA * jnp.maximum(1.0 + M_MARGIN - s, 0.0)
                   * (s - (1.0 - M_MARGIN)))
        logit_n = GAMMA * jnp.maximum(s + M_MARGIN, 0.0) * (s - M_MARGIN)

        if mask_cols:   # static: only emitted when K is not a multiple of TK
            col = jax.lax.broadcasted_iota(jnp.int32, (1, TK), 1) + k_tile * TK
            valid = col < K
            pos_m = jnp.logical_and(is_pos, valid)
            neg_m = jnp.logical_and(jnp.logical_not(is_pos), valid)
        else:
            pos_m = is_pos
            neg_m = jnp.logical_not(is_pos)

        lp_tile = jnp.where(pos_m, logit_p, NEG)
        ln_tile = jnp.where(neg_m, logit_n, NEG)

        # ---- online logsumexp update (state carried in resident output refs) ----
        mp_old = mp_ref[...]
        mp_new = jnp.maximum(mp_old, jnp.max(lp_tile, axis=-1, keepdims=True))
        lp_ref[...] = (lp_ref[...] * jnp.exp(mp_old - mp_new)
                       + jnp.sum(jnp.exp(lp_tile - mp_new), axis=-1, keepdims=True))
        mp_ref[...] = mp_new

        mn_old = mn_ref[...]
        mn_new = jnp.maximum(mn_old, jnp.max(ln_tile, axis=-1, keepdims=True))
        ln_ref[...] = (ln_ref[...] * jnp.exp(mn_old - mn_new)
                       + jnp.sum(jnp.exp(ln_tile - mn_new), axis=-1, keepdims=True))
        mn_ref[...] = mn_new

    if skip_oob:        # static: only emitted when tiles don't split evenly
        pl.when(k_tile < n_tiles)(compute)
    else:
        compute()


def normalize(x):
    return x / (jnp.linalg.norm(x, axis=-1, keepdims=True) + 1e-12)


def moco_id_loss(q1, q2, memory, pseudo_label, memory_label, *, tk=None):
    """q1, q2: (B, D); memory: (K, D) (any float dtype); labels: int."""
    B, D = q1.shape
    K = memory.shape[0]
    mem_itemsize = jnp.dtype(memory.dtype).itemsize

    # ---- hoisted per-batch work (tiny; also reused by the queue update) ----
    q1n = normalize(q1.astype(jnp.float32))
    q2n = normalize(q2.astype(jnp.float32))
    qmean = (q1n + q2n) * 0.5
    l_pos_self = jnp.sum(q1n * q2n, axis=-1, keepdims=True)            # (B, 1)
    # self column logits (is_pos = 1 / is_neg = 0), exactly as the reference
    lp_self = (-GAMMA * jax.nn.relu(1.0 + M_MARGIN - l_pos_self)
               * (l_pos_self - (1.0 - M_MARGIN)))
    ln_self = jnp.full_like(lp_self, GAMMA * M_MARGIN * (0.0 - M_MARGIN) - 99999.0)

    # ---- pad batch to a full 8-sublane multiple so every vreg is dense ----
    B_pad = max(8, _round_up(B, 8))

    def pad_b(x):
        return x if B_pad == B else jnp.pad(x, ((0, B_pad - B), (0, 0)))

    qmean_p = pad_b(qmean)
    plabel_p = pad_b(pseudo_label.reshape(B, 1).astype(jnp.int32))
    lp_self_p = pad_b(lp_self)
    ln_self_p = pad_b(ln_self)
    mlabel = memory_label.reshape(1, K).astype(jnp.int32)

    # ---- K tiling: ~4 MiB per queue tile keeps the double-buffered stream
    #      well inside VMEM on every generation (incl. v7x's 64 MiB). ----
    if tk is None:
        rows_budget = max(128, (4 * 1024 * 1024) // max(D * mem_itemsize, 1))
        tk = min(4096, (rows_budget // 128) * 128)
    TK = min(_round_up(tk, 128), _round_up(K, 128))
    n_tiles = pl.cdiv(K, TK)
    n_cores = 2 if n_tiles >= 2 else 1     # v7x: stream disjoint queue halves per TC
    tpc = pl.cdiv(n_tiles, n_cores)        # K-tiles per core
    max_blk = n_tiles - 1                  # clamp fully-OOB blocks (skipped in-kernel)
    skip_oob = (n_cores * tpc != n_tiles)  # static specialization flags
    mask_cols = (n_tiles * TK != K)

    if skip_oob:
        mem_idx = lambda c, j: (jnp.minimum(c * tpc + j, max_blk), 0)
        mlab_idx = lambda c, j: (0, jnp.minimum(c * tpc + j, max_blk))
    else:
        mem_idx = lambda c, j: (c * tpc + j, 0)
        mlab_idx = lambda c, j: (0, c * tpc + j)

    qmean_spec = pl.BlockSpec((B_pad, D), lambda c, j: (0, 0))
    col_spec = pl.BlockSpec((B_pad, 1), lambda c, j: (0, 0))
    mem_spec = pl.BlockSpec((TK, D), mem_idx)
    mlab_spec = pl.BlockSpec((1, TK), mlab_idx)
    part_spec = pl.BlockSpec((None, B_pad, 1), lambda c, j: (c, 0, 0))
    part_shape = jax.ShapeDtypeStruct((n_cores, B_pad, 1), jnp.float32)

    # double-buffered queue tile + label tile + small resident operands + slack
    vmem_limit = min(
        64 * 1024 * 1024,
        max(16 * 1024 * 1024,
            2 * TK * D * mem_itemsize + 2 * TK * 4 + 4 * 1024 * 1024))

    kernel = functools.partial(
        _moco_tile_kernel, K=K, TK=TK, tiles_per_core=tpc, n_tiles=n_tiles,
        mask_cols=mask_cols, skip_oob=skip_oob)
    mp, lp, mn, ln = pl.pallas_call(
        kernel,
        grid=(n_cores, tpc),
        in_specs=[qmean_spec, col_spec, col_spec, col_spec, mem_spec, mlab_spec],
        out_specs=(part_spec,) * 4,
        out_shape=(part_shape,) * 4,
        compiler_params=pltpu.CompilerParams(
            dimension_semantics=("parallel", "arbitrary"),
            vmem_limit_bytes=int(vmem_limit),
        ),
    )(qmean_p, plabel_p, lp_self_p, ln_self_p, memory, mlabel)

    # ---- tiny cross-core combine + softplus + mean (B-sized, plain JAX) ----
    lse_p = jax.nn.logsumexp(mp + jnp.log(lp), axis=0)[:B, 0]
    lse_n = jax.nn.logsumexp(mn + jnp.log(ln), axis=0)[:B, 0]
    z = lse_p + lse_n
    sp = jnp.maximum(z, 0.0) + jnp.log1p(jnp.exp(-jnp.abs(z)))   # stable softplus
    return jnp.mean(sp) / 18.0


def moco_id_loss_reference(q1, q2, memory, pseudo_label, memory_label):
    """Pure-JAX reference mirroring the PyTorch forward exactly."""
    B = q1.shape[0]
    q1n = normalize(q1)
    q2n = normalize(q2)
    is_pos = (pseudo_label[:, None] == memory_label[None, :]).astype(jnp.float32)
    is_pos = jnp.concatenate([jnp.ones((B, 1)), is_pos], axis=1)
    is_neg = (pseudo_label[:, None] != memory_label[None, :]).astype(jnp.float32)
    is_neg = jnp.concatenate([jnp.zeros((B, 1)), is_neg], axis=1)
    l_logist = (memory @ ((q1n + q2n) / 2.0).T).T
    l_pos_self = jnp.sum(q1n * q2n, axis=-1, keepdims=True)
    sim_mat = jnp.concatenate([l_pos_self, l_logist], axis=1)
    s_p = sim_mat * is_pos
    s_n = sim_mat * is_neg
    alpha_p = jax.nn.relu(-s_p + 1 + M_MARGIN)
    alpha_n = jax.nn.relu(s_n + M_MARGIN)
    logit_p = -GAMMA * alpha_p * (s_p - (1 - M_MARGIN))
    logit_n = GAMMA * alpha_n * (s_n - M_MARGIN)

    def lse(v):
        mx = jnp.max(v, axis=1, keepdims=True)
        return mx[:, 0] + jnp.log(jnp.sum(jnp.exp(v - mx), axis=1))

    z = lse(logit_p - 99999.0 * is_neg) + lse(logit_n - 99999.0 * is_pos)
    sp = jnp.maximum(z, 0.0) + jnp.log1p(jnp.exp(-jnp.abs(z)))
    return jnp.mean(sp) / 18.0


def queue_update(memory, index_memory, q_index, q1n, q2n, queue_index):
    """Functional equivalent of the in-place queue update (plain JAX glue)."""
    # TODO(synk): the PyTorch in-place index_copy_ on registered buffers has no
    # in-kernel equivalent; kept as a functional scatter in JAX.
    B = q1n.shape[0]
    K = memory.shape[0]
    out_ids = (jnp.arange(B) + queue_index) % K
    memory = memory.at[out_ids].set(((q1n + q2n) / 2.0).astype(memory.dtype))
    index_memory = index_memory.at[out_ids].set(q_index)
    new_index = (queue_index + B) % K
    return memory, index_memory, new_index


if __name__ == "__main__":
    # Small shapes consistent with the module: inputSize=D, queueSize=K.
    B, D, K = 8, 32, 384
    NUM_IDX, NUM_CLASSES = 64, 10

    key = jax.random.PRNGKey(0)
    k1, k2, k3, k4 = jax.random.split(key, 4)

    q1 = jax.random.normal(k1, (B, D), dtype=jnp.float32)
    q2 = jax.random.normal(k2, (B, D), dtype=jnp.float32)
    index = jax.random.randint(k3, (B,), 0, NUM_IDX, dtype=jnp.int32)

    # memory buffer init: uniform in [-stdv, stdv], stdv = 1/sqrt(D/3)
    stdv = 1.0 / math.sqrt(D / 3.0)
    memory = jax.random.uniform(k4, (K, D), minval=-stdv, maxval=stdv,
                                dtype=jnp.float32)
    # index_memory: half populated, half still -1 (as after a few updates)
    index_memory = jnp.where(
        jnp.arange(K) < K // 2,
        jax.random.randint(jax.random.PRNGKey(7), (K,), 0, NUM_IDX,
                           dtype=jnp.int32),
        jnp.full((K,), -1, dtype=jnp.int32))

    # index2label[choice_c] as a dense lookup table (deterministic, synthetic)
    label_table = (jnp.arange(NUM_IDX, dtype=jnp.int32) % NUM_CLASSES)

    # Label glue (dict/gather lookups stay in plain JAX)
    pseudo_label = label_table[index]                                   # (B,)
    memory_label = jnp.where(index_memory == -1, -1,
                             label_table[jnp.clip(index_memory, 0)])    # (K,)

    loss_ref = moco_id_loss_reference(q1, q2, memory, pseudo_label, memory_label)

    # tk=128: multi-tile streaming, 2-way core split, skipped-OOB-tile path.
    loss_a = jax.block_until_ready(
        moco_id_loss(q1, q2, memory, pseudo_label, memory_label, tk=128))
    # tk=256: partial edge tile -> in-kernel column-mask path.
    loss_b = jax.block_until_ready(
        moco_id_loss(q1, q2, memory, pseudo_label, memory_label, tk=256))

    assert jnp.allclose(loss_a, loss_ref, atol=5e-4, rtol=5e-4), (loss_a, loss_ref)
    assert jnp.allclose(loss_b, loss_ref, atol=5e-4, rtol=5e-4), (loss_b, loss_ref)

    # queue update side effect (functional, plain JAX glue)
    q1n, q2n = normalize(q1), normalize(q2)
    memory, index_memory, new_index = queue_update(
        memory, index_memory, index, q1n, q2n, queue_index=0)
    jax.block_until_ready((memory, index_memory))

    print("KERNEL_OK")
</pallas_src>

<mosaic_0001>
module attributes {stable_mosaic.version = 11 : i64} {
  func.func @_moco_tile_kernel(%arg0: i32, %arg1: i32, %arg2: memref<8x32xf32, #tpu.memory_space<vmem>>, %arg3: memref<8x1xi32, #tpu.memory_space<vmem>>, %arg4: memref<8x1xf32, #tpu.memory_space<vmem>>, %arg5: memref<8x1xf32, #tpu.memory_space<vmem>>, %arg6: memref<128x32xf32, #tpu.memory_space<vmem>>, %arg7: memref<1x128xi32, #tpu.memory_space<vmem>>, %arg8: memref<1x8x1xf32, #tpu.memory_space<vmem>>, %arg9: memref<1x8x1xf32, #tpu.memory_space<vmem>>, %arg10: memref<1x8x1xf32, #tpu.memory_space<vmem>>, %arg11: memref<1x8x1xf32, #tpu.memory_space<vmem>>) attributes {dimension_semantics = [#tpu.dimension_semantics<parallel>, #tpu.dimension_semantics<arbitrary>], iteration_bounds = array<i64: 2, 2>, scalar_prefetch = 0 : i64, scratch_operands = 0 : i64, tpu.core_type = #tpu.core_type<tc>, window_params = [{pipeline_mode = #tpu.pipeline_mode<synchronous>, transform_indices = @transform_0, window_bounds = array<i64: 8, 32>}, {pipeline_mode = #tpu.pipeline_mode<synchronous>, transform_indices = @transform_1, window_bounds = array<i64: 8, 1>}, {pipeline_mode = #tpu.pipeline_mode<synchronous>, transform_indices = @transform_2, window_bounds = array<i64: 8, 1>}, {pipeline_mode = #tpu.pipeline_mode<synchronous>, transform_indices = @transform_3, window_bounds = array<i64: 8, 1>}, {transform_indices = @transform_4, window_bounds = array<i64: 128, 32>}, {transform_indices = @transform_5, window_bounds = array<i64: 1, 128>}, {transform_indices = @transform_6, window_bounds = array<i64: 1, 8, 1>}, {transform_indices = @transform_7, window_bounds = array<i64: 1, 8, 1>}, {transform_indices = @transform_8, window_bounds = array<i64: 1, 8, 1>}, {transform_indices = @transform_9, window_bounds = array<i64: 1, 8, 1>}]} {
    %c2_i32 = arith.constant 2 : i32
    %0 = arith.muli %arg0, %c2_i32 : i32
    %1 = arith.addi %0, %arg1 : i32
    %c0_i32 = arith.constant 0 : i32
    %2 = arith.cmpi eq, %arg1, %c0_i32 : i32
    %c0_i32_0 = arith.constant 0 : i32
    %3 = arith.cmpi eq, %arg0, %c0_i32_0 : i32
    %4 = arith.andi %2, %3 : i1
    %5 = arith.extui %4 : i1 to i32
    %c0_i32_1 = arith.constant 0 : i32
    %6 = arith.cmpi ne, %5, %c0_i32_1 : i32
    scf.if %6 {
      %c0 = arith.constant 0 : index
      %c0_6 = arith.constant 0 : index
      %15 = vector.load %arg4[%c0, %c0_6] : memref<8x1xf32, #tpu.memory_space<vmem>>, vector<8x1xf32>
      %c0_7 = arith.constant 0 : index
      %c0_8 = arith.constant 0 : index
      %c0_9 = arith.constant 0 : index
      %16 = vector.load %arg8[%c0_7, %c0_8, %c0_9] : memref<1x8x1xf32, #tpu.memory_space<vmem>>, vector<1x8x1xf32>
      %17 = vector.shape_cast %16 : vector<1x8x1xf32> to vector<8x1xf32>
      %18 = vector.shape_cast %15 : vector<8x1xf32> to vector<1x8x1xf32>
      tpu.vector_store %arg8[%c0_7, %c0_8, %c0_9], %18 {strides = array<i32>} : memref<1x8x1xf32, #tpu.memory_space<vmem>>, vector<1x8x1xf32>,
      %cst = arith.constant 1.000000e+00 : f32
      %19 = vector.broadcast %cst : f32 to vector<8x1xf32>
      %c0_10 = arith.constant 0 : index
      %c0_11 = arith.constant 0 : index
      %c0_12 = arith.constant 0 : index
      %20 = vector.load %arg9[%c0_10, %c0_11, %c0_12] : memref<1x8x1xf32, #tpu.memory_space<vmem>>, vector<1x8x1xf32>
      %21 = vector.shape_cast %20 : vector<1x8x1xf32> to vector<8x1xf32>
      %22 = vector.shape_cast %19 : vector<8x1xf32> to vector<1x8x1xf32>
      tpu.vector_store %arg9[%c0_10, %c0_11, %c0_12], %22 {strides = array<i32>} : memref<1x8x1xf32, #tpu.memory_space<vmem>>, vector<1x8x1xf32>,
      %c0_13 = arith.constant 0 : index
      %c0_14 = arith.constant 0 : index
      %23 = vector.load %arg5[%c0_13, %c0_14] : memref<8x1xf32, #tpu.memory_space<vmem>>, vector<8x1xf32>
      %c0_15 = arith.constant 0 : index
      %c0_16 = arith.constant 0 : index
      %c0_17 = arith.constant 0 : index
      %24 = vector.load %arg10[%c0_15, %c0_16, %c0_17] : memref<1x8x1xf32, #tpu.memory_space<vmem>>, vector<1x8x1xf32>
      %25 = vector.shape_cast %24 : vector<1x8x1xf32> to vector<8x1xf32>
      %26 = vector.shape_cast %23 : vector<8x1xf32> to vector<1x8x1xf32>
      tpu.vector_store %arg10[%c0_15, %c0_16, %c0_17], %26 {strides = array<i32>} : memref<1x8x1xf32, #tpu.memory_space<vmem>>, vector<1x8x1xf32>,
      %cst_18 = arith.constant 1.000000e+00 : f32
      %27 = vector.broadcast %cst_18 : f32 to vector<8x1xf32>
      %c0_19 = arith.constant 0 : index
      %c0_20 = arith.constant 0 : index
      %c0_21 = arith.constant 0 : index
      %28 = vector.load %arg11[%c0_19, %c0_20, %c0_21] : memref<1x8x1xf32, #tpu.memory_space<vmem>>, vector<1x8x1xf32>
      %29 = vector.shape_cast %28 : vector<1x8x1xf32> to vector<8x1xf32>
      %30 = vector.shape_cast %27 : vector<8x1xf32> to vector<1x8x1xf32>
      tpu.vector_store %arg11[%c0_19, %c0_20, %c0_21], %30 {strides = array<i32>} : memref<1x8x1xf32, #tpu.memory_space<vmem>>, vector<1x8x1xf32>,
    } else {
    }
    %c0_i32_2 = arith.constant 0 : i32
    %7 = arith.cmpi eq, %arg1, %c0_i32_2 : i32
    %c0_i32_3 = arith.constant 0 : i32
    %8 = arith.cmpi ne, %arg0, %c0_i32_3 : i32
    %9 = arith.andi %7, %8 : i1
    %10 = arith.extui %9 : i1 to i32
    %c0_i32_4 = arith.constant 0 : i32
    %11 = arith.cmpi ne, %10, %c0_i32_4 : i32
    scf.if %11 {
      %cst = arith.constant -1.000000e+30 : f32
      %15 = vector.broadcast %cst : f32 to vector<8x1xf32>
      %c0 = arith.constant 0 : index
      %c0_6 = arith.constant 0 : index
      %c0_7 = arith.constant 0 : index
      %16 = vector.load %arg8[%c0, %c0_6, %c0_7] : memref<1x8x1xf32, #tpu.memory_space<vmem>>, vector<1x8x1xf32>
      %17 = vector.shape_cast %16 : vector<1x8x1xf32> to vector<8x1xf32>
      %18 = vector.shape_cast %15 : vector<8x1xf32> to vector<1x8x1xf32>
      tpu.vector_store %arg8[%c0, %c0_6, %c0_7], %18 {strides = array<i32>} : memref<1x8x1xf32, #tpu.memory_space<vmem>>, vector<1x8x1xf32>,
      %cst_8 = arith.constant 0.000000e+00 : f32
      %19 = vector.broadcast %cst_8 : f32 to vector<8x1xf32>
      %c0_9 = arith.constant 0 : index
      %c0_10 = arith.constant 0 : index
      %c0_11 = arith.constant 0 : index
      %20 = vector.load %arg9[%c0_9, %c0_10, %c0_11] : memref<1x8x1xf32, #tpu.memory_space<vmem>>, vector<1x8x1xf32>
      %21 = vector.shape_cast %20 : vector<1x8x1xf32> to vector<8x1xf32>
      %22 = vector.shape_cast %19 : vector<8x1xf32> to vector<1x8x1xf32>
      tpu.vector_store %arg9[%c0_9, %c0_10, %c0_11], %22 {strides = array<i32>} : memref<1x8x1xf32, #tpu.memory_space<vmem>>, vector<1x8x1xf32>,
      %cst_12 = arith.constant -1.000000e+30 : f32
      %23 = vector.broadcast %cst_12 : f32 to vector<8x1xf32>
      %c0_13 = arith.constant 0 : index
      %c0_14 = arith.constant 0 : index
      %c0_15 = arith.constant 0 : index
      %24 = vector.load %arg10[%c0_13, %c0_14, %c0_15] : memref<1x8x1xf32, #tpu.memory_space<vmem>>, vector<1x8x1xf32>
      %25 = vector.shape_cast %24 : vector<1x8x1xf32> to vector<8x1xf32>
      %26 = vector.shape_cast %23 : vector<8x1xf32> to vector<1x8x1xf32>
      tpu.vector_store %arg10[%c0_13, %c0_14, %c0_15], %26 {strides = array<i32>} : memref<1x8x1xf32, #tpu.memory_space<vmem>>, vector<1x8x1xf32>,
      %cst_16 = arith.constant 0.000000e+00 : f32
      %27 = vector.broadcast %cst_16 : f32 to vector<8x1xf32>
      %c0_17 = arith.constant 0 : index
      %c0_18 = arith.constant 0 : index
      %c0_19 = arith.constant 0 : index
      %28 = vector.load %arg11[%c0_17, %c0_18, %c0_19] : memref<1x8x1xf32, #tpu.memory_space<vmem>>, vector<1x8x1xf32>
      %29 = vector.shape_cast %28 : vector<1x8x1xf32> to vector<8x1xf32>
      %30 = vector.shape_cast %27 : vector<8x1xf32> to vector<1x8x1xf32>
      tpu.vector_store %arg11[%c0_17, %c0_18, %c0_19], %30 {strides = array<i32>} : memref<1x8x1xf32, #tpu.memory_space<vmem>>, vector<1x8x1xf32>,
    } else {
    }
    %c3_i32 = arith.constant 3 : i32
    %12 = arith.cmpi slt, %1, %c3_i32 : i32
    %13 = arith.extui %12 : i1 to i32
    %c0_i32_5 = arith.constant 0 : i32
    %14 = arith.cmpi ne, %13, %c0_i32_5 : i32
    scf.if %14 {
      %c0 = arith.constant 0 : index
      %c0_6 = arith.constant 0 : index
      %15 = vector.load %arg6[%c0, %c0_6] : memref<128x32xf32, #tpu.memory_space<vmem>>, vector<128x32xf32>
      %c0_7 = arith.constant 0 : index
      %c0_8 = arith.constant 0 : index
      %16 = vector.load %arg2[%c0_7, %c0_8] : memref<8x32xf32, #tpu.memory_space<vmem>>, vector<8x32xf32>
      %cst = arith.constant dense<0.000000e+00> : vector<8x128xf32>
      %17 = tpu.matmul %16, %15, %cst {dimension_numbers = #tpu.dot_dimension_numbers<[1], [1], [0], [0], [0, 0, 1, 0], [], []>} : vector<8x32xf32>, vector<128x32xf32>, vector<8x128xf32> -> vector<8x128xf32>
      %c0_9 = arith.constant 0 : index
      %c0_10 = arith.constant 0 : index
      %18 = vector.load %arg3[%c0_9, %c0_10] : memref<8x1xi32, #tpu.memory_space<vmem>>, vector<8x1xi32>
      %c0_11 = arith.constant 0 : index
      %c0_12 = arith.constant 0 : index
      %19 = vector.load %arg7[%c0_11, %c0_12] : memref<1x128xi32, #tpu.memory_space<vmem>>, vector<1x128xi32>
      %20 = vector.broadcast %18 : vector<8x1xi32> to vector<8x128xi32>
      %21 = vector.broadcast %19 : vector<1x128xi32> to vector<8x128xi32>
      %22 = arith.cmpi eq, %20, %21 : vector<8x128xi32>
      %cst_13 = arith.constant 1.250000e+00 : f32
      %23 = vector.broadcast %cst_13 : f32 to vector<8x128xf32>
      %24 = arith.subf %23, %17 : vector<8x128xf32>
      %cst_14 = arith.constant 0.000000e+00 : f32
      %25 = vector.broadcast %cst_14 : f32 to vector<8x128xf32>
      %26 = arith.maximumf %24, %25 : vector<8x128xf32>
      %cst_15 = arith.constant -1.280000e+02 : f32
      %27 = vector.broadcast %cst_15 : f32 to vector<8x128xf32>
      %28 = arith.mulf %27, %26 : vector<8x128xf32>
      %cst_16 = arith.constant 7.500000e-01 : f32
      %29 = vector.broadcast %cst_16 : f32 to vector<8x128xf32>
      %30 = arith.subf %17, %29 : vector<8x128xf32>
      %31 = arith.mulf %28, %30 : vector<8x128xf32>
      %cst_17 = arith.constant 2.500000e-01 : f32
      %32 = vector.broadcast %cst_17 : f32 to vector<8x128xf32>
      %33 = arith.addf %17, %32 : vector<8x128xf32>
      %cst_18 = arith.constant 0.000000e+00 : f32
      %34 = vector.broadcast %cst_18 : f32 to vector<8x128xf32>
      %35 = arith.maximumf %33, %34 : vector<8x128xf32>
      %cst_19 = arith.constant 1.280000e+02 : f32
      %36 = vector.broadcast %cst_19 : f32 to vector<8x128xf32>
      %37 = arith.mulf %36, %35 : vector<8x128xf32>
      %cst_20 = arith.constant 2.500000e-01 : f32
      %38 = vector.broadcast %cst_20 : f32 to vector<8x128xf32>
      %39 = arith.subf %17, %38 : vector<8x128xf32>
      %40 = arith.mulf %37, %39 : vector<8x128xf32>
      %cst_21 = arith.constant dense<true> : vector<8x128xi1>
      %41 = arith.xori %22, %cst_21 : vector<8x128xi1>
      %cst_22 = arith.constant -1.000000e+30 : f32
      %42 = vector.broadcast %cst_22 : f32 to vector<8x128xf32>
      %43 = arith.select %22, %31, %42 : vector<8x128xi1>, vector<8x128xf32>
      %cst_23 = arith.constant -1.000000e+30 : f32
      %44 = vector.broadcast %cst_23 : f32 to vector<8x128xf32>
      %45 = arith.select %41, %40, %44 : vector<8x128xi1>, vector<8x128xf32>
      %c0_24 = arith.constant 0 : index
      %c0_25 = arith.constant 0 : index
      %c0_26 = arith.constant 0 : index
      %46 = vector.load %arg8[%c0_24, %c0_25, %c0_26] : memref<1x8x1xf32, #tpu.memory_space<vmem>>, vector<1x8x1xf32>
      %47 = vector.shape_cast %46 : vector<1x8x1xf32> to vector<8x1xf32>
      %cst_27 = arith.constant dense<0xFF800000> : vector<8xf32>
      %48 = vector.multi_reduction <maximumf>, %43, %cst_27 [1] : vector<8x128xf32> to vector<8xf32>
      %49 = vector.shape_cast %48 : vector<8xf32> to vector<8x1xf32>
      %50 = arith.maximumf %47, %49 : vector<8x1xf32>
      %c0_28 = arith.constant 0 : index
      %c0_29 = arith.constant 0 : index
      %c0_30 = arith.constant 0 : index
      %51 = vector.load %arg9[%c0_28, %c0_29, %c0_30] : memref<1x8x1xf32, #tpu.memory_space<vmem>>, vector<1x8x1xf32>
      %52 = vector.shape_cast %51 : vector<1x8x1xf32> to vector<8x1xf32>
      %53 = arith.subf %47, %50 : vector<8x1xf32>
      %54 = math.exp %53 : vector<8x1xf32>
      %55 = arith.mulf %52, %54 : vector<8x1xf32>
      %56 = vector.broadcast %50 : vector<8x1xf32> to vector<8x128xf32>
      %57 = arith.subf %43, %56 : vector<8x128xf32>
      %58 = math.exp %57 : vector<8x128xf32>
      %cst_31 = arith.constant dense<0.000000e+00> : vector<8xf32>
      %59 = vector.multi_reduction <add>, %58, %cst_31 [1] : vector<8x128xf32> to vector<8xf32>
      %60 = vector.shape_cast %59 : vector<8xf32> to vector<8x1xf32>
      %61 = arith.addf %55, %60 : vector<8x1xf32>
      %c0_32 = arith.constant 0 : index
      %c0_33 = arith.constant 0 : index
      %c0_34 = arith.constant 0 : index
      %62 = vector.load %arg9[%c0_32, %c0_33, %c0_34] : memref<1x8x1xf32, #tpu.memory_space<vmem>>, vector<1x8x1xf32>
      %63 = vector.shape_cast %62 : vector<1x8x1xf32> to vector<8x1xf32>
      %64 = vector.shape_cast %61 : vector<8x1xf32> to vector<1x8x1xf32>
      tpu.vector_store %arg9[%c0_32, %c0_33, %c0_34], %64 {strides = array<i32>} : memref<1x8x1xf32, #tpu.memory_space<vmem>>, vector<1x8x1xf32>,
      %c0_35 = arith.constant 0 : index
      %c0_36 = arith.constant 0 : index
      %c0_37 = arith.constant 0 : index
      %65 = vector.load %arg8[%c0_35, %c0_36, %c0_37] : memref<1x8x1xf32, #tpu.memory_space<vmem>>, vector<1x8x1xf32>
      %66 = vector.shape_cast %65 : vector<1x8x1xf32> to vector<8x1xf32>
      %67 = vector.shape_cast %50 : vector<8x1xf32> to vector<1x8x1xf32>
      tpu.vector_store %arg8[%c0_35, %c0_36, %c0_37], %67 {strides = array<i32>} : memref<1x8x1xf32, #tpu.memory_space<vmem>>, vector<1x8x1xf32>,
      %c0_38 = arith.constant 0 : index
      %c0_39 = arith.constant 0 : index
      %c0_40 = arith.constant 0 : index
      %68 = vector.load %arg10[%c0_38, %c0_39, %c0_40] : memref<1x8x1xf32, #tpu.memory_space<vmem>>, vector<1x8x1xf32>
      %69 = vector.shape_cast %68 : vector<1x8x1xf32> to vector<8x1xf32>
      %cst_41 = arith.constant dense<0xFF800000> : vector<8xf32>
      %70 = vector.multi_reduction <maximumf>, %45, %cst_41 [1] : vector<8x128xf32> to vector<8xf32>
      %71 = vector.shape_cast %70 : vector<8xf32> to vector<8x1xf32>
      %72 = arith.maximumf %69, %71 : vector<8x1xf32>
      %c0_42 = arith.constant 0 : index
      %c0_43 = arith.constant 0 : index
      %c0_44 = arith.constant 0 : index
      %73 = vector.load %arg11[%c0_42, %c0_43, %c0_44] : memref<1x8x1xf32, #tpu.memory_space<vmem>>, vector<1x8x1xf32>
      %74 = vector.shape_cast %73 : vector<1x8x1xf32> to vector<8x1xf32>
      %75 = arith.subf %69, %72 : vector<8x1xf32>
      %76 = math.exp %75 : vector<8x1xf32>
      %77 = arith.mulf %74, %76 : vector<8x1xf32>
      %78 = vector.broadcast %72 : vector<8x1xf32> to vector<8x128xf32>
      %79 = arith.subf %45, %78 : vector<8x128xf32>
      %80 = math.exp %79 : vector<8x128xf32>
      %cst_45 = arith.constant dense<0.000000e+00> : vector<8xf32>
      %81 = vector.multi_reduction <add>, %80, %cst_45 [1] : vector<8x128xf32> to vector<8xf32>
      %82 = vector.shape_cast %81 : vector<8xf32> to vector<8x1xf32>
      %83 = arith.addf %77, %82 : vector<8x1xf32>
      %c0_46 = arith.constant 0 : index
      %c0_47 = arith.constant 0 : index
      %c0_48 = arith.constant 0 : index
      %84 = vector.load %arg11[%c0_46, %c0_47, %c0_48] : memref<1x8x1xf32, #tpu.memory_space<vmem>>, vector<1x8x1xf32>
      %85 = vector.shape_cast %84 : vector<1x8x1xf32> to vector<8x1xf32>
      %86 = vector.shape_cast %83 : vector<8x1xf32> to vector<1x8x1xf32>
      tpu.vector_store %arg11[%c0_46, %c0_47, %c0_48], %86 {strides = array<i32>} : memref<1x8x1xf32, #tpu.memory_space<vmem>>, vector<1x8x1xf32>,
      %c0_49 = arith.constant 0 : index
      %c0_50 = arith.constant 0 : index
      %c0_51 = arith.constant 0 : index
      %87 = vector.load %arg10[%c0_49, %c0_50, %c0_51] : memref<1x8x1xf32, #tpu.memory_space<vmem>>, vector<1x8x1xf32>
      %88 = vector.shape_cast %87 : vector<1x8x1xf32> to vector<8x1xf32>
      %89 = vector.shape_cast %72 : vector<8x1xf32> to vector<1x8x1xf32>
      tpu.vector_store %arg10[%c0_49, %c0_50, %c0_51], %89 {strides = array<i32>} : memref<1x8x1xf32, #tpu.memory_space<vmem>>, vector<1x8x1xf32>,
    } else {
    }
    return
  }
  func.func @transform_0(%arg0: i32, %arg1: i32) -> (i32, i32) {
    %c0_i32 = arith.constant 0 : i32
    %c0_i32_0 = arith.constant 0 : i32
    %c0_i32_1 = arith.constant 0 : i32
    return %c0_i32, %c0_i32_0 : i32, i32
  }
  func.func @transform_1(%arg0: i32, %arg1: i32) -> (i32, i32) {
    %c0_i32 = arith.constant 0 : i32
    %c0_i32_0 = arith.constant 0 : i32
    %c0_i32_1 = arith.constant 0 : i32
    return %c0_i32, %c0_i32_0 : i32, i32
  }
  func.func @transform_2(%arg0: i32, %arg1: i32) -> (i32, i32) {
    %c0_i32 = arith.constant 0 : i32
    %c0_i32_0 = arith.constant 0 : i32
    %c0_i32_1 = arith.constant 0 : i32
    return %c0_i32, %c0_i32_0 : i32, i32
  }
  func.func @transform_3(%arg0: i32, %arg1: i32) -> (i32, i32) {
    %c0_i32 = arith.constant 0 : i32
    %c0_i32_0 = arith.constant 0 : i32
    %c0_i32_1 = arith.constant 0 : i32
    return %c0_i32, %c0_i32_0 : i32, i32
  }
  func.func @transform_4(%arg0: i32, %arg1: i32) -> (i32, i32) {
    %c2_i32 = arith.constant 2 : i32
    %0 = arith.muli %arg0, %c2_i32 : i32
    %1 = arith.addi %0, %arg1 : i32
    %c2_i32_0 = arith.constant 2 : i32
    %2 = arith.minsi %1, %c2_i32_0 : i32
    %c0_i32 = arith.constant 0 : i32
    %c0_i32_1 = arith.constant 0 : i32
    return %2, %c0_i32 : i32, i32
  }
  func.func @transform_5(%arg0: i32, %arg1: i32) -> (i32, i32) {
    %c2_i32 = arith.constant 2 : i32
    %0 = arith.muli %arg0, %c2_i32 : i32
    %1 = arith.addi %0, %arg1 : i32
    %c2_i32_0 = arith.constant 2 : i32
    %2 = arith.minsi %1, %c2_i32_0 : i32
    %c0_i32 = arith.constant 0 : i32
    %c0_i32_1 = arith.constant 0 : i32
    return %c0_i32, %2 : i32, i32
  }
  func.func @transform_6(%arg0: i32, %arg1: i32) -> (i32, i32, i32) {
    %c0_i32 = arith.constant 0 : i32
    %c0_i32_0 = arith.constant 0 : i32
    %c0_i32_1 = arith.constant 0 : i32
    return %arg0, %c0_i32, %c0_i32_0 : i32, i32, i32
  }
  func.func @transform_7(%arg0: i32, %arg1: i32) -> (i32, i32, i32) {
    %c0_i32 = arith.constant 0 : i32
    %c0_i32_0 = arith.constant 0 : i32
    %c0_i32_1 = arith.constant 0 : i32
    return %arg0, %c0_i32, %c0_i32_0 : i32, i32, i32
  }
  func.func @transform_8(%arg0: i32, %arg1: i32) -> (i32, i32, i32) {
    %c0_i32 = arith.constant 0 : i32
    %c0_i32_0 = arith.constant 0 : i32
    %c0_i32_1 = arith.constant 0 : i32
    return %arg0, %c0_i32, %c0_i32_0 : i32, i32, i32
  }
  func.func @transform_9(%arg0: i32, %arg1: i32) -> (i32, i32, i32) {
    %c0_i32 = arith.constant 0 : i32
    %c0_i32_0 = arith.constant 0 : i32
    %c0_i32_1 = arith.constant 0 : i32
    return %arg0, %c0_i32, %c0_i32_0 : i32, i32, i32
  }
}

</mosaic_0001>

<bundles_post_ra>
// kernel: tpu_custom_call.1
= control target key start
LH: loop header
LB: loop body
LE: loop exit
PB: predicated region body
PF: predicated region fallthrough
CT: control target
= control target key end

     0   :  { %s990_s30 = smov 0   ;;  %s992_s10 = smov 0   ;;  %s1156_s0 = inlined_call_operand.vmem [shape: f32[8,32], index: 0, kind: input, shape index: {}]   ;;  %s1157_s1 = inlined_call_operand.vmem [shape: s32[8,1], index: 1, kind: input, shape index: {}]   ;;  %s1158_s2 = inlined_call_operand.vmem [shape: f32[8,1], index: 2, kind: input, shape index: {}]   ;;  %s1159_s3 = inlined_call_operand.vmem [shape: f32[8,1], index: 3, kind: input, shape index: {}]   ;;  %s1160_s4 = inlined_call_operand.vmem [shape: f32[384,32], index: 4, kind: input, shape index: {}]   ;;  %s1161_s5 = inlined_call_operand.vmem [shape: s32[1,384], index: 5, kind: input, shape index: {}]   ;;  %s1162_s6 = inlined_call_operand.vmem [shape: f32[2,8,1], index: 6, kind: output, shape index: {0}]   ;;  %s1163_s7 = inlined_call_operand.vmem [shape: f32[2,8,1], index: 7, kind: output, shape index: {1}]   ;;  %s1164_s8 = inlined_call_operand.vmem [shape: f32[2,8,1], index: 8, kind: output, shape index: {2}]   ;;  %s1165_s9 = inlined_call_operand.vmem [shape: f32[2,8,1], index: 9, kind: output, shape index: {3}]  }
   0x1   :  { %1168 = sst [smem:[#allocation6_spill]] %s1162_s6  ;;  %s994_s11 = smov 0  }
   0x2   :  { %1169 = sst [smem:[#allocation7_spill]] %s1163_s7  ;;  %s996_s12 = smov 0  }
   0x3   :  { %s998_s13 = smov 0  }
   0x4 LB: > { %1170 = sst [smem:[#allocation2_spill]] %s925_s11  ;;  %s29_s14 = sadd.s32 1, %s925_s11  ;;  %s933_s13 = sphi %s998_s13, %s20_s13   ;;  %s929_s12 = sphi %s996_s12, %s1179_s12   ;;  %s925_s11 = sphi %s994_s11, %s1178_s11   ;;  %s921_s10 = sphi %s992_s10, %s1177_s10   ;;  %s917_s30 = sphi %s990_s30, %s1176_s30  }
   0x5   : > { %1171 = sst [smem:[#allocation3_spill]] %s929_s12  ;;  %s32_s15 = sadd.s32 1, %s929_s12 }
   0x6   : > { %p30_p0 = scmp.ge.s32.totalorder %s29_s14, 2  ;;  %p803_p1 = scmp.ge.s32.totalorder %s933_s13, 1 }
   0x7   : > { %p347_p2 = scmp.lt.s32.totalorder %s933_s13, 5 }
   0x8   : > { %s1181_s14 = smov (%p30_p0, %s29_s14), 0  ;;  %s1183_s15 = smov (!%p30_p0, %s32_s15), %s929_s12 }
   0x9   : > { %1172 = sst [smem:[#allocation4_spill]] %s1181_s14  ;;  %p348_p3 = pnand %p803_p1, %p347_p2 }
   0xa   : > { %p34_p4 = scmp.ge.s32.totalorder %s1183_s15, 2  ;;  %s804_s16 = sshll.u32 (!%p348_p3), %s921_s10, 1 }
   0xb   : > { %351 = sbr.rel (%p348_p3) target bundleno = 617 (0x269), region = 44  ;;  %p430_p5 = scmp.lt.s32.totalorder (!%p348_p3), %s921_s10, 1 }
   0xc   : > { %s1185_s15 = smov (%p34_p4, %s1183_s15), 0  ;;  %s1027_s17 = sadd.s32 (!%p348_p3), %s917_s30, %s804_s16 }
   0xd   : > { %1173 = sst [smem:[#allocation5_spill]] %s1185_s15  ;;  %p448_p6 = scmp.eq.s32.totalorder (!%p348_p3), %s917_s30, 0 }
   0xe   : > { %p407_p7 = scmp.lt.s32.totalorder (!%p348_p3), %s1027_s17, 2  ;;  %p449_p8 = scmp.eq.s32.totalorder (!%p348_p3), %s921_s10, 0 }
   0xf   : > { %s1174_s6 = sld [smem:[#allocation6_spill]] (!%p348_p3) }
  0x10   : > { %s431_s18 = scalar_select %p430_p5, %s921_s10, 1 }
  0x11   : > { %s408_s19 = scalar_select %p407_p7, %s1027_s17, 2 }
  0x12   : > { %s811_s20 = sshll.u32 %s431_s18, 3  ;;  %p450_p9 = pnand %p449_p8, %p448_p6 }
  0x13   : > { %s805_s21 = sshll.u32 %s408_s19, 4  ;;  %s1175_s7 = sld [smem:[#allocation7_spill]] }
  0x14   : > { %p410_p10 = scmp.lt.s32.totalorder %s805_s21, 47  ;;  %s1187_s19 = smov (!%p407_p7, %s408_s19), 2 }
  0x15   : > { %s1039_s24 = scalar_lea.vmem %s1174_s6, %s811_s20  ;;  %s425_s16 = scalar_lea.vmem %s1161_s5, %s1187_s19 }
  0x16   : > { %s1189_s21 = smov (!%p410_p10, %s805_s21), 47  ;;  %s1055_s22 = scalar_lea.vmem %s1164_s8, %s811_s20 }
  0x17   : > { %s806_s23 = sshll.u32 %s1189_s21, 3  ;;  %s1060_s25 = scalar_lea.vmem %s1165_s9, %s811_s20 }
  0x18   : > { %s1065_s12 = scalar_lea.vmem %s1160_s4, %s806_s23  ;;  %453 = sbr.rel (%p450_p9) target bundleno = 34 (0x22), region = 48 }
  0x19   : > { %s1044_s27 = scalar_lea.vmem %s1175_s7, %s811_s20 }
  0x1d   : > { %v454_v0 = vld [vmem:[%s1158_s2] sm:$0xff]  ;;  %vm455_vm0 = vcmask 7168   ;;  %v935_v2 = vmov 1.0  }
  0x1e   : > { %456 = vst.msk [vmem:[%s1039_s24] sm:$0xff] %vm455_vm0, %v454_v0  ;;  %v458_v1 = vld [vmem:[%s1159_s3] sm:$0xff] }
  0x1f   : > { %457 = vst.msk [vmem:[%s1044_s27] sm:$0xff] %vm455_vm0, %v935_v2 }
  0x20   : > { %460 = vst.msk [vmem:[%s1060_s25] sm:$0xff] %vm455_vm0, %v935_v2 }
  0x21   : > { %459 = vst.msk [vmem:[%s1055_s22] sm:$0xff] %vm455_vm0, %v458_v1 }
  0x22 PF: > { %p461_p11 = scmp.ne.s32.totalorder %s921_s10, 0 }
  0x24   : > { %p462_p12 = pnand %p461_p11, %p448_p6 }
  0x26   : > { %465 = sbr.rel (%p462_p12) target bundleno = 48 (0x30), region = 52 }
  0x2b   : > { %vm466_vm1 = vcmask 7168   ;;  %v936_v3 = vmov -1e+30   ;;  %v937_v4 = vmov 0.0  }
  0x2c   : > { %467 = vst.msk [vmem:[%s1039_s24] sm:$0xff] %vm466_vm1, %v936_v3 }
  0x2d   : > { %469 = vst.msk [vmem:[%s1055_s22] sm:$0xff] %vm466_vm1, %v936_v3 }
  0x2e   : > { %468 = vst.msk [vmem:[%s1044_s27] sm:$0xff] %vm466_vm1, %v937_v4 }
  0x2f   : > { %470 = vst.msk [vmem:[%s1060_s25] sm:$0xff] %vm466_vm1, %v937_v4 }
  0x30 PF: > { %p816_p13 = scmp.ge.s32.totalorder %s1027_s17, 3 }
  0x32   : > { %474 = sbr.rel (%p816_p13) target bundleno = 617 (0x269), region = 56 }
  0x37   : > { %v490_v5 = vld [vmem:[%s1065_s12 + $0x78] sm:$0xff]  ;;  %vm492_vm2 = vcmask 261120   ;;  %v489_v6 = vld [vmem:[%s1065_s12 + $0x70] sm:$0xff]  ;;  %v488_v7 = vld [vmem:[%s1065_s12 + $0x68] sm:$0xff]  ;;  %v938_v15 = vmov 0   ;;  %vm939_vm4 = vmmov 1  }
  0x38   : > { %817 = vmatpush.xpose.msk.msra.mxu0 %vm492_vm2, %v490_v5  ;;  %v487_v8 = vld [vmem:[%s1065_s12 + $0x60] sm:$0xff]  ;;  %v486_v9 = vld [vmem:[%s1065_s12 + $0x58] sm:$0xff]  ;;  %v485_v10 = vld [vmem:[%s1065_s12 + $0x50] sm:$0xff]  ;;  %883 = vset.pattern.permute.xlu0 %v938_v15  ;;  %vm604_vm6 = vcmask 7168  }
  0x39   : > { %v484_v11 = vld [vmem:[%s1065_s12 + $0x48] sm:$0xff]  ;;  %v483_v12 = vld [vmem:[%s1065_s12 + $0x40] sm:$0xff]  ;;  %v482_v13 = vld [vmem:[%s1065_s12 + $0x38] sm:$0xff]  ;;  %885 = vset.pattern.permute.xlu2 %v938_v15  ;;  %884 = vset.pattern.permute.xlu1 %v938_v15 }
  0x3a   : > { %v564_v14 = vld [vmem:[%s1157_s1] sm:$0xff]  ;;  %v481_v16 = vld [vmem:[%s1065_s12 + $0x30] sm:$0xff]  ;;  %v480_v17 = vld [vmem:[%s1065_s12 + $0x28] sm:$0xff] }
  0x3b   : > { %567 = vperm.xlu0 %883, %v564_v14   ;;  %v479_v18 = vld [vmem:[%s1065_s12 + $0x20] sm:$0xff]  ;;  %v478_v19 = vld [vmem:[%s1065_s12 + $0x18] sm:$0xff]  ;;  %v477_v20 = vld [vmem:[%s1065_s12 + $0x10] sm:$0xff] }
  0x3c   : > { %818 = vmatpush.xpose.msk.msra.mxu0 %vm492_vm2, %v489_v6  ;;  %v476_v21 = vld [vmem:[%s1065_s12 + $0x8] sm:$0xff]  ;;  %v475_v22 = vld [vmem:[%s1065_s12] sm:$0xff] }
  0x3d   : > { %v491_v23 = vld [vmem:[%s1156_s0] sm:$0xff] }
  0x3e   : > { %v886_v24 = vld [vmem:[%s425_s16] ss:$0 sm:$0xff] }
  0x3f   : > { %v607_v39 = vld [vmem:[%s1055_s22] sm:$0xff] }
  0x40   : > { %819 = vmatpush.xpose.msk.msra.mxu0 %vm492_vm2, %v488_v7  ;;  %v584_v40 = vld [vmem:[%s1039_s24] sm:$0xff] }
  0x41   : > { %v611_v57 = vld [vmem:[%s1060_s25] sm:$0xff] }
  0x42   : > { %v588_v63 = vld [vmem:[%s1044_s27] sm:$0xff] }
  0x44   : > { %820 = vmatpush.xpose.msk.msra.mxu0 %vm492_vm2, %v487_v8 }
  0x48   : > { %821 = vmatpush.xpose.msk.msra.mxu0 %vm492_vm2, %v486_v9 }
  0x4c   : > { %822 = vmatpush.xpose.msk.msra.mxu0 %vm492_vm2, %v485_v10 }
  0x50   : > { %823 = vmatpush.xpose.msk.msra.mxu0 %vm492_vm2, %v484_v11 }
  0x54   : > { %824 = vmatpush.xpose.msk.msra.mxu0 %vm492_vm2, %v483_v12 }
  0x58   : > { %825 = vmatpush.xpose.msk.msra.mxu0 %vm492_vm2, %v482_v13 }
  0x5c   : > { %826 = vmatpush.xpose.msk.msra.mxu0 %vm492_vm2, %v481_v16 }
  0x60   : > { %827 = vmatpush.xpose.msk.msra.mxu0 %vm492_vm2, %v480_v17 }
  0x64   : > { %828 = vmatpush.xpose.msk.msra.mxu0 %vm492_vm2, %v479_v18 }
  0x68   : > { %829 = vmatpush.xpose.msk.msra.mxu0 %vm492_vm2, %v478_v19 }
  0x6c   : > { %830 = vmatpush.xpose.msk.msra.mxu0 %vm492_vm2, %v477_v20 }
  0x70   : > { %831 = vmatpush.xpose.msk.msra.mxu0 %vm492_vm2, %v476_v21 }
  0x74   : > { %832 = vmatpush.xpose.msk.msra.mxu0 %vm492_vm2, %v475_v22 }
  0x77   : > { %833 = vmatmul.msk.f32.vlgmr.msra.gmra.mxu0 %vm492_vm2, %v491_v23 }
  0xad   : > { %v568_v26 = vpop.permute.xlu0 %567 }
  0xae   : > { %vm570_vm3 = vcmp.eq.s32.totalorder %v568_v26, %v886_v24 }
  0xaf   : > { %vm581_vm5 = vmxor %vm570_vm3, %vm939_vm4 }
  0xf4   : > { %v561_v25 = vpop.f32.mrf.mxu0 }
  0xf5   : > { %v571_v27 = vsub.f32 1.25, %v561_v25  ;;  %v576_v28 = vadd.f32 0.25, %v561_v25  ;;  %v834_v31 = vadd.f32 -0.75, %v561_v25  ;;  %v835_v32 = vadd.f32 -0.25, %v561_v25 }
  0xf7   : > { %v572_v29 = vmax.f32 %v571_v27, 0.0  ;;  %v577_v30 = vmax.f32 %v576_v28, 0.0 }
  0xf9   : > { %v578_v33 = vmul.f32 128.0, %v577_v30  ;;  %v573_v34 = vmul.f32 -128.0, %v572_v29 }
  0xfb   : > { %v580_v35 = vmul.f32 %v835_v32, %v578_v33  ;;  %v575_v36 = vmul.f32 %v834_v31, %v573_v34 }
  0xfd   : > { %v583_v37 = vsel %vm581_vm5, %v580_v35, -1e+30  ;;  %v582_v38 = vsel %vm570_vm3, %v575_v36, -1e+30 }
  0xfe   : > { %608 = vmax.xlane.f32.xlu1 %v583_v37  ;;  %585 = vmax.xlane.f32.xlu0 %v582_v38 }
 0x171   : > { %v609_v41 = vpop.xlane.xlu1 %608  ;;  %v586_v42 = vpop.xlane.xlu0 %585 }
 0x172   : > { %v610_v43 = vmax.f32 %v607_v39, %v609_v41  ;;  %v587_v44 = vmax.f32 %v584_v40, %v586_v42 }
 0x174   : > { %v612_v45 = vsub.f32 %v607_v39, %v610_v43  ;;  %628 = vst.msk [vmem:[%s1055_s22] sm:$0xff] %vm604_vm6, %v610_v43  ;;  %v589_v46 = vsub.f32 %v584_v40, %v587_v44  ;;  %618 = vperm.xlu2 %885, %v610_v43   ;;  %595 = vperm.xlu1 %884, %v587_v44  }
 0x175   : > { %606 = vst.msk [vmem:[%s1039_s24] sm:$0xff] %vm604_vm6, %v587_v44 }
 0x176   : > { %v613_v55 = vmul.f32 1.442695, %v612_v45  ;;  %v590_v61 = vmul.f32 1.442695, %v589_v46 }
 0x1ce   : > { %v619_v47 = vpop.permute.xlu2 %618 }
 0x1cf   : > { %v621_v48 = vsub.f32 %v583_v37, %v619_v47 }
 0x1d1   : > { %v622_v49 = vmul.f32 1.442695, %v621_v48 }
 0x1d3   : > { %887 = vpow2.f32 %v622_v49 }
 0x1d9   : > { %v888_v50 = vpop.eup %887 }
 0x1da   : > { %624 = vadd.xlane.f32.xlu1 %v888_v50 }
 0x1e6   : > { %v596_v51 = vpop.permute.xlu1 %595 }
 0x1e7   : > { %v598_v52 = vsub.f32 %v582_v38, %v596_v51 }
 0x1e9   : > { %v599_v53 = vmul.f32 1.442695, %v598_v52 }
 0x1eb   : > { %889 = vpow2.f32 %v599_v53 }
 0x1ec   : > { %891 = vpow2.f32 %v613_v55 }
 0x1ed   : > { %893 = vpow2.f32 %v590_v61 }
 0x1f1   : > { %v890_v54 = vpop.eup %889 }
 0x1f2   : > { %601 = vadd.xlane.f32.xlu2 %v890_v54  ;;  %v892_v56 = vpop.eup %891 }
 0x1f3   : > { %v615_v58 = vmul.f32 %v892_v56, %v611_v57  ;;  %v894_v62 = vpop.eup %893 }
 0x1f4   : > { %v592_v0 = vmul.f32 %v894_v62, %v588_v63 }
 0x24d   : > { %v625_v59 = vpop.xlane.xlu1 %624 }
 0x24e   : > { %v626_v60 = vadd.f32 %v625_v59, %v615_v58 }
 0x250   : > { %627 = vst.msk [vmem:[%s1060_s25] sm:$0xff] %vm604_vm6, %v626_v60 }
 0x265   : > { %v602_v1 = vpop.xlane.xlu2 %601 }
 0x266   : > { %v603_v2 = vadd.f32 %v602_v1, %v592_v0 }
 0x268   : > { %605 = vst.msk [vmem:[%s1044_s27] sm:$0xff] %vm604_vm6, %v603_v2 }
 0x269 PF: > { %s20_s13 = sadd.s32 1, %s933_s13   ;;  %s1176_s30 = sld [smem:[#allocation2_spill]] }
 0x26a   : > { %p17_p0 = scmp.ge.s32.totalorder %s20_s13, 6   ;;  %s1177_s10 = sld [smem:[#allocation3_spill]] }
 0x26b   : > { %s1178_s11 = sld [smem:[#allocation4_spill]] }
 0x26c   : > { %s1179_s12 = sld [smem:[#allocation5_spill]]  ;;  %19 = sbr.rel (!%p17_p0) target bundleno = 4 (0x4), region = 125 }

</bundles_post_ra>
